<compile_context>
chip_gen: v5e
topology: v5e:2x2
jax: 0.10.0
libtpu: 0.0.40
codegen_flags: <defaults>
</compile_context>

<pallas_src>
import jax
import jax.numpy as jnp
from jax import lax
from jax.experimental import pallas as pl
from jax.experimental.pallas import tpu as pltpu


def _round_up(x, m):
    return ((x + m - 1) // m) * m


def critic_kernel(x_ref, w1t_ref, b1_ref, w2t_ref, b2_ref, w3_ref, b3_ref, o_ref):
    # x_ref: (Bt, S) natural layout.  Contract on S so the batch lands on the
    # lane axis -> all activations are (H, Bt); f32 MXU with f32 accumulation.
    h1 = lax.dot_general(w1t_ref[...], x_ref[...],
                         (((1,), (1,)), ((), ())),
                         preferred_element_type=jnp.float32)        # (H, Bt)
    h1 = jnp.maximum(h1 + b1_ref[...], 0.0)
    # fc2 + ReLU: (H, H) @ (H, Bt) -> (H, Bt)
    h2 = jnp.dot(w2t_ref[...], h1, preferred_element_type=jnp.float32)
    h2 = jnp.maximum(h2 + b2_ref[...], 0.0)
    # fc3 (value head): VPU multiply + sublane (XLU) reduce -> lane-dense (1, Bt).
    v = jnp.sum(h2 * w3_ref[...], axis=0, keepdims=True)
    o_ref[...] = (v + b3_ref[...]).astype(o_ref.dtype)


def _batch_dim_semantics(grid_b):
    # On v7x (2 TensorCores/chip) shard the batch grid axis across the cores;
    # plain "parallel" elsewhere (measured no-op on single-TC v5e/v6e).
    try:
        kind = jax.devices()[0].device_kind.lower()
    except Exception:
        kind = ""
    if grid_b >= 2 and "v7" in kind:
        return (pltpu.CORE_PARALLEL,)
    return ("parallel",)


def critic_forward(x, params, *, block_b=2048):
    """x: (B, state_dim) f32.  Returns (B, 1) f32 (same semantics as the torch module)."""
    w1, b1, w2, b2, w3, b3 = params
    B, S = x.shape
    H = w1.shape[1]

    # Batch tile: multiple of 256, clamped down for tiny rollouts (so B=8 pads
    # to 256, not 2048) and capped at 16K columns for the v7x 64 MiB VMEM budget.
    bb = max(256, min(_round_up(block_b, 256), _round_up(B, 256), 16384))
    grid_b = pl.cdiv(B, bb)
    Bp = grid_b * bb

    # Only cheap layout plumbing in the wrapper: pad the batch axis.  The
    # transpose to the (H, Bt) activation layout happens inside the kernel.
    xp = jnp.pad(x.astype(jnp.float32), ((0, Bp - B), (0, 0)))       # (Bp, S)
    w1t = jnp.asarray(w1, jnp.float32).T                             # (H, S)
    w2t = jnp.asarray(w2, jnp.float32).T                             # (H, H)
    b1c = jnp.asarray(b1, jnp.float32).reshape(H, 1)                 # (H, 1)
    b2c = jnp.asarray(b2, jnp.float32).reshape(H, 1)                 # (H, 1)
    w3c = jnp.asarray(w3, jnp.float32).reshape(H, 1)                 # (H, 1)
    b3c = jnp.asarray(b3, jnp.float32).reshape(1, 1)                 # (1, 1)

    def const(a):  # weight/bias stays VMEM-resident across all grid steps
        return pl.BlockSpec(a.shape, lambda i: (0, 0))

    out = pl.pallas_call(
        critic_kernel,
        out_shape=jax.ShapeDtypeStruct((1, Bp), jnp.float32),
        grid=(grid_b,),
        in_specs=[
            pl.BlockSpec((bb, S), lambda i: (i, 0)),   # per-step batch tile of x
            const(w1t), const(b1c), const(w2t), const(b2c), const(w3c), const(b3c),
        ],
        out_specs=pl.BlockSpec((1, bb), lambda i: (0, i)),
        compiler_params=pltpu.CompilerParams(
            dimension_semantics=_batch_dim_semantics(grid_b)),
    )(xp, w1t, b1c, w2t, b2c, w3c, b3c)
    # Padded tail columns (B..Bp) carry bias->ReLU garbage and are sliced off here;
    # nothing downstream may read them.
    return out[0, :B].reshape(B, 1)


def init_params(key, state_dim, hidden_dim):
    # Deterministic synthetic init (scaled normal); stored as (in, out) so the
    # forward is x @ W + b (same math as nn.Linear with W^T).
    k1, k2, k3, k4, k5, k6 = jax.random.split(key, 6)
    w1 = jax.random.normal(k1, (state_dim, hidden_dim), jnp.float32) / jnp.sqrt(state_dim * 1.0)
    b1 = jax.random.normal(k2, (1, hidden_dim), jnp.float32) * 0.01
    w2 = jax.random.normal(k3, (hidden_dim, hidden_dim), jnp.float32) / jnp.sqrt(hidden_dim * 1.0)
    b2 = jax.random.normal(k4, (1, hidden_dim), jnp.float32) * 0.01
    w3 = jax.random.normal(k5, (hidden_dim, 1), jnp.float32) / jnp.sqrt(hidden_dim * 1.0)
    b3 = jax.random.normal(k6, (1, 1), jnp.float32) * 0.01
    return (w1, b1, w2, b2, w3, b3)


def critic_reference_f32(x, params):
    w1, b1, w2, b2, w3, b3 = params
    h1 = jnp.maximum(x @ w1 + b1, 0.0)
    h2 = jnp.maximum(h1 @ w2 + b2, 0.0)
    return h2 @ w3 + b3


if __name__ == "__main__":
    state_dim = 12   # FlappyBird-v0 observation dim with use_lidar=False
    hidden_dim = 128

    key = jax.random.PRNGKey(0)
    kx, kp = jax.random.split(key)
    params = init_params(kp, state_dim, hidden_dim)
    fwd = jax.jit(critic_forward, static_argnames=("block_b",))

    # batch=8: tiny rollout (clamped single tile); batch=300: padding path;
    # batch=600 with block_b=256: exercises grid > 1.
    for batch, bb in ((8, 2048), (300, 2048), (600, 256)):
        x = jax.random.normal(jax.random.fold_in(kx, batch),
                              (batch, state_dim), jnp.float32)
        out = jax.block_until_ready(fwd(x, params, block_b=bb))
        ref = critic_reference_f32(x, params)
        assert out.shape == (batch, 1), out.shape
        assert jnp.allclose(out, ref, atol=2e-3, rtol=2e-3), \
            f"mismatch vs f32 reference (batch={batch})"

    print("KERNEL_OK")
</pallas_src>

<mosaic_0001>
module attributes {stable_mosaic.version = 11 : i64} {
  func.func @critic_kernel(%arg0: i32, %arg1: memref<256x12xf32, #tpu.memory_space<vmem>>, %arg2: memref<128x12xf32, #tpu.memory_space<vmem>>, %arg3: memref<128x1xf32, #tpu.memory_space<vmem>>, %arg4: memref<128x128xf32, #tpu.memory_space<vmem>>, %arg5: memref<128x1xf32, #tpu.memory_space<vmem>>, %arg6: memref<128x1xf32, #tpu.memory_space<vmem>>, %arg7: memref<1x1xf32, #tpu.memory_space<vmem>>, %arg8: memref<1x256xf32, #tpu.memory_space<vmem>>) attributes {dimension_semantics = [#tpu.dimension_semantics<parallel>], iteration_bounds = array<i64: 1>, scalar_prefetch = 0 : i64, scratch_operands = 0 : i64, tpu.core_type = #tpu.core_type<tc>, window_params = [{transform_indices = @transform_0, window_bounds = array<i64: 256, 12>}, {pipeline_mode = #tpu.pipeline_mode<synchronous>, transform_indices = @transform_1, window_bounds = array<i64: 128, 12>}, {pipeline_mode = #tpu.pipeline_mode<synchronous>, transform_indices = @transform_2, window_bounds = array<i64: 128, 1>}, {pipeline_mode = #tpu.pipeline_mode<synchronous>, transform_indices = @transform_3, window_bounds = array<i64: 128, 128>}, {pipeline_mode = #tpu.pipeline_mode<synchronous>, transform_indices = @transform_4, window_bounds = array<i64: 128, 1>}, {pipeline_mode = #tpu.pipeline_mode<synchronous>, transform_indices = @transform_5, window_bounds = array<i64: 128, 1>}, {pipeline_mode = #tpu.pipeline_mode<synchronous>, transform_indices = @transform_6, window_bounds = array<i64: 1, 1>}, {transform_indices = @transform_7, window_bounds = array<i64: 1, 256>}]} {
    %c0 = arith.constant 0 : index
    %c0_0 = arith.constant 0 : index
    %0 = vector.load %arg2[%c0, %c0_0] : memref<128x12xf32, #tpu.memory_space<vmem>>, vector<128x12xf32>
    %c0_1 = arith.constant 0 : index
    %c0_2 = arith.constant 0 : index
    %1 = vector.load %arg1[%c0_1, %c0_2] : memref<256x12xf32, #tpu.memory_space<vmem>>, vector<256x12xf32>
    %cst = arith.constant dense<0.000000e+00> : vector<128x256xf32>
    %2 = tpu.matmul %0, %1, %cst {dimension_numbers = #tpu.dot_dimension_numbers<[1], [1], [0], [0], [0, 0, 1, 0], [], []>} : vector<128x12xf32>, vector<256x12xf32>, vector<128x256xf32> -> vector<128x256xf32>
    %c0_3 = arith.constant 0 : index
    %c0_4 = arith.constant 0 : index
    %3 = vector.load %arg3[%c0_3, %c0_4] : memref<128x1xf32, #tpu.memory_space<vmem>>, vector<128x1xf32>
    %4 = vector.broadcast %3 : vector<128x1xf32> to vector<128x256xf32>
    %5 = arith.addf %2, %4 : vector<128x256xf32>
    %cst_5 = arith.constant 0.000000e+00 : f32
    %6 = vector.broadcast %cst_5 : f32 to vector<128x256xf32>
    %7 = arith.maximumf %5, %6 : vector<128x256xf32>
    %c0_6 = arith.constant 0 : index
    %c0_7 = arith.constant 0 : index
    %8 = vector.load %arg4[%c0_6, %c0_7] : memref<128x128xf32, #tpu.memory_space<vmem>>, vector<128x128xf32>
    %cst_8 = arith.constant dense<0.000000e+00> : vector<128x256xf32>
    %9 = tpu.matmul %8, %7, %cst_8 {dimension_numbers = #tpu.dot_dimension_numbers<[1], [0], [0], [1], [0, 0, 1, 1], [], []>} : vector<128x128xf32>, vector<128x256xf32>, vector<128x256xf32> -> vector<128x256xf32>
    %c0_9 = arith.constant 0 : index
    %c0_10 = arith.constant 0 : index
    %10 = vector.load %arg5[%c0_9, %c0_10] : memref<128x1xf32, #tpu.memory_space<vmem>>, vector<128x1xf32>
    %11 = vector.broadcast %10 : vector<128x1xf32> to vector<128x256xf32>
    %12 = arith.addf %9, %11 : vector<128x256xf32>
    %cst_11 = arith.constant 0.000000e+00 : f32
    %13 = vector.broadcast %cst_11 : f32 to vector<128x256xf32>
    %14 = arith.maximumf %12, %13 : vector<128x256xf32>
    %c0_12 = arith.constant 0 : index
    %c0_13 = arith.constant 0 : index
    %15 = vector.load %arg6[%c0_12, %c0_13] : memref<128x1xf32, #tpu.memory_space<vmem>>, vector<128x1xf32>
    %16 = vector.broadcast %15 : vector<128x1xf32> to vector<128x256xf32>
    %17 = arith.mulf %14, %16 : vector<128x256xf32>
    %cst_14 = arith.constant dense<0.000000e+00> : vector<256xf32>
    %18 = vector.multi_reduction <add>, %17, %cst_14 [0] : vector<128x256xf32> to vector<256xf32>
    %19 = vector.shape_cast %18 : vector<256xf32> to vector<1x256xf32>
    %c0_15 = arith.constant 0 : index
    %c0_16 = arith.constant 0 : index
    %20 = vector.load %arg7[%c0_15, %c0_16] : memref<1x1xf32, #tpu.memory_space<vmem>>, vector<1x1xf32>
    %21 = vector.broadcast %20 : vector<1x1xf32> to vector<1x256xf32>
    %22 = arith.addf %19, %21 : vector<1x256xf32>
    %c0_17 = arith.constant 0 : index
    %c0_18 = arith.constant 0 : index
    %23 = vector.load %arg8[%c0_17, %c0_18] : memref<1x256xf32, #tpu.memory_space<vmem>>, vector<1x256xf32>
    tpu.vector_store %arg8[%c0_17, %c0_18], %22 {strides = array<i32>} : memref<1x256xf32, #tpu.memory_space<vmem>>, vector<1x256xf32>,
    return
  }
  func.func @transform_0(%arg0: i32) -> (i32, i32) {
    %c0_i32 = arith.constant 0 : i32
    %c0_i32_0 = arith.constant 0 : i32
    return %arg0, %c0_i32 : i32, i32
  }
  func.func @transform_1(%arg0: i32) -> (i32, i32) {
    %c0_i32 = arith.constant 0 : i32
    %c0_i32_0 = arith.constant 0 : i32
    %c0_i32_1 = arith.constant 0 : i32
    return %c0_i32, %c0_i32_0 : i32, i32
  }
  func.func @transform_2(%arg0: i32) -> (i32, i32) {
    %c0_i32 = arith.constant 0 : i32
    %c0_i32_0 = arith.constant 0 : i32
    %c0_i32_1 = arith.constant 0 : i32
    return %c0_i32, %c0_i32_0 : i32, i32
  }
  func.func @transform_3(%arg0: i32) -> (i32, i32) {
    %c0_i32 = arith.constant 0 : i32
    %c0_i32_0 = arith.constant 0 : i32
    %c0_i32_1 = arith.constant 0 : i32
    return %c0_i32, %c0_i32_0 : i32, i32
  }
  func.func @transform_4(%arg0: i32) -> (i32, i32) {
    %c0_i32 = arith.constant 0 : i32
    %c0_i32_0 = arith.constant 0 : i32
    %c0_i32_1 = arith.constant 0 : i32
    return %c0_i32, %c0_i32_0 : i32, i32
  }
  func.func @transform_5(%arg0: i32) -> (i32, i32) {
    %c0_i32 = arith.constant 0 : i32
    %c0_i32_0 = arith.constant 0 : i32
    %c0_i32_1 = arith.constant 0 : i32
    return %c0_i32, %c0_i32_0 : i32, i32
  }
  func.func @transform_6(%arg0: i32) -> (i32, i32) {
    %c0_i32 = arith.constant 0 : i32
    %c0_i32_0 = arith.constant 0 : i32
    %c0_i32_1 = arith.constant 0 : i32
    return %c0_i32, %c0_i32_0 : i32, i32
  }
  func.func @transform_7(%arg0: i32) -> (i32, i32) {
    %c0_i32 = arith.constant 0 : i32
    %c0_i32_0 = arith.constant 0 : i32
    return %c0_i32, %arg0 : i32, i32
  }
}

</mosaic_0001>

<bundles_post_ra>
// kernel: critic_forward.1
= control target key start
LH: loop header
LB: loop body
LE: loop exit
PB: predicated region body
PF: predicated region fallthrough
CT: control target
= control target key end

     0   :  { %vm172_vm0 = vcmask 97280   ;;  %v1015_v4 = vmov 0   ;;  %vm935_vm1 = vcmask 1040384   ;;  %s1558_s0 = inlined_call_operand.vmem [shape: f32[256,12], index: 0, kind: input, shape index: {}]   ;;  %s1559_s2 = inlined_call_operand.vmem [shape: f32[128,1], index: 2, kind: input, shape index: {}]   ;;  %s1560_s1 = inlined_call_operand.vmem [shape: f32[128,12], index: 1, kind: input, shape index: {}]   ;;  %s1561_s4 = inlined_call_operand.vmem [shape: f32[128,1], index: 4, kind: input, shape index: {}]   ;;  %s1562_s5 = inlined_call_operand.vmem [shape: f32[128,1], index: 5, kind: input, shape index: {}]   ;;  %s1563_s6 = inlined_call_operand.<no memory space> [shape: f32[1,1], index: 6, kind: input, shape index: {}]   ;;  %s1564_s3 = inlined_call_operand.vmem [shape: f32[128,128], index: 3, kind: input, shape index: {}]   ;;  %s1565_s7 = inlined_call_operand.vmem [shape: f32[1,256], index: 7, kind: output, shape index: {}]  }
   0x1   :  { %v59_v0 = vld [vmem:[%s1558_s0 + $0x78] sm:$0xff]  ;;  %v58_v2 = vld [vmem:[%s1558_s0 + $0x70] sm:$0xff]  ;;  %1012 = vset.pattern.permute.xlu0 %v1015_v4  ;;  %1013 = vset.pattern.permute.xlu1 %v1015_v4  ;;  %v57_v5 = vld [vmem:[%s1558_s0 + $0x68] sm:$0xff] }
   0x2   :  { %v75_v1 = vld [vmem:[%s1558_s0 + $0xf8] sm:$0xff]  ;;  %947 = vmatpush.xpose.msk.msra.mxu0 %vm172_vm0, %v59_v0  ;;  %v74_v3 = vld [vmem:[%s1558_s0 + $0xf0] sm:$0xff]  ;;  %1014 = vset.pattern.permute.xlu2 %v1015_v4  ;;  %v73_v6 = vld [vmem:[%s1558_s0 + $0xe8] sm:$0xff] }
   0x3   :  { %979 = vmatpush.xpose.msk.msra.mxu1 %vm172_vm0, %v75_v1  ;;  %v91_v7 = vld [vmem:[%s1559_s2 + $0x78] sm:$0xff]  ;;  %v56_v8 = vld [vmem:[%s1558_s0 + $0x60] sm:$0xff]  ;;  %v90_v10 = vld [vmem:[%s1559_s2 + $0x70] sm:$0xff] }
   0x4   :  { %169 = vperm.xlu0 %1012, %v91_v7   ;;  %v72_v9 = vld [vmem:[%s1558_s0 + $0xe0] sm:$0xff]  ;;  %v55_v11 = vld [vmem:[%s1558_s0 + $0x58] sm:$0xff]  ;;  %v54_v13 = vld [vmem:[%s1558_s0 + $0x50] sm:$0xff] }
   0x5   :  { %v71_v12 = vld [vmem:[%s1558_s0 + $0xd8] sm:$0xff]  ;;  %v70_v14 = vld [vmem:[%s1558_s0 + $0xd0] sm:$0xff]  ;;  %v85_v15 = vld [vmem:[%s1559_s2 + $0x48] sm:$0xff] }
   0x6   :  { %948 = vmatpush.xpose.msk.msra.mxu0 %vm172_vm0, %v58_v2  ;;  %v53_v16 = vld [vmem:[%s1558_s0 + $0x48] sm:$0xff]  ;;  %v52_v19 = vld [vmem:[%s1558_s0 + $0x40] sm:$0xff]  ;;  %v82_v21 = vld [vmem:[%s1559_s2 + $0x30] sm:$0xff] }
   0x7   :  { %980 = vmatpush.xpose.msk.msra.mxu1 %vm172_vm0, %v74_v3  ;;  %v69_v17 = vld [vmem:[%s1558_s0 + $0xc8] sm:$0xff]  ;;  %v68_v20 = vld [vmem:[%s1558_s0 + $0xc0] sm:$0xff]  ;;  %v51_v22 = vld [vmem:[%s1558_s0 + $0x38] sm:$0xff] }
   0x8   :  { %v89_v18 = vld [vmem:[%s1559_s2 + $0x68] sm:$0xff]  ;;  %v67_v23 = vld [vmem:[%s1558_s0 + $0xb8] sm:$0xff]  ;;  %v88_v24 = vld [vmem:[%s1559_s2 + $0x60] sm:$0xff] }
   0x9   :  { %159 = vperm.xlu1 %1013, %v89_v18   ;;  %v50_v25 = vld [vmem:[%s1558_s0 + $0x30] sm:$0xff]  ;;  %v79_v27 = vld [vmem:[%s1559_s2 + $0x18] sm:$0xff]  ;;  %v49_v28 = vld [vmem:[%s1558_s0 + $0x28] sm:$0xff] }
   0xa   :  { %949 = vmatpush.xpose.msk.msra.mxu0 %vm172_vm0, %v57_v5  ;;  %v66_v26 = vld [vmem:[%s1558_s0 + $0xb0] sm:$0xff]  ;;  %v65_v29 = vld [vmem:[%s1558_s0 + $0xa8] sm:$0xff]  ;;  %v87_v30 = vld [vmem:[%s1559_s2 + $0x58] sm:$0xff] }
   0xb   :  { %981 = vmatpush.xpose.msk.msra.mxu1 %vm172_vm0, %v73_v6  ;;  %v84_v31 = vld [vmem:[%s1559_s2 + $0x40] sm:$0xff]  ;;  %149 = vperm.xlu2 %1014, %v87_v30   ;;  %v47_v35 = vld [vmem:[%s1558_s0 + $0x18] sm:$0xff]  ;;  %v86_v37 = vld [vmem:[%s1559_s2 + $0x50] sm:$0xff] }
   0xc   :  { %164 = vperm.xlu0 %1012, %v90_v10   ;;  %v48_v32 = vld [vmem:[%s1558_s0 + $0x20] sm:$0xff]  ;;  %v63_v36 = vld [vmem:[%s1558_s0 + $0x98] sm:$0xff]  ;;  %v81_v38 = vld [vmem:[%s1559_s2 + $0x28] sm:$0xff] }
   0xd   :  { %v64_v33 = vld [vmem:[%s1558_s0 + $0xa0] sm:$0xff]  ;;  %v46_v39 = vld [vmem:[%s1558_s0 + $0x10] sm:$0xff]  ;;  %v45_v41 = vld [vmem:[%s1558_s0 + $0x8] sm:$0xff] }
   0xe   :  { %950 = vmatpush.xpose.msk.msra.mxu0 %vm172_vm0, %v56_v8  ;;  %v76_v34 = vld [vmem:[%s1559_s2] sm:$0xff]  ;;  %v62_v40 = vld [vmem:[%s1558_s0 + $0x90] sm:$0xff]  ;;  %v61_v42 = vld [vmem:[%s1558_s0 + $0x88] sm:$0xff] }
   0xf   :  { %982 = vmatpush.xpose.msk.msra.mxu1 %vm172_vm0, %v72_v9  ;;  %v83_v43 = vld [vmem:[%s1559_s2 + $0x38] sm:$0xff]  ;;  %v78_v44 = vld [vmem:[%s1559_s2 + $0x10] sm:$0xff]  ;;  %v44_v45 = vld [vmem:[%s1558_s0] sm:$0xff] }
  0x10   :  { %v60_v46 = vld [vmem:[%s1558_s0 + $0x80] sm:$0xff]  ;;  %v29_v49 = vld [vmem:[%s1560_s1 + $0x8] sm:$0xff]  ;;  %v497_v50 = vld [vmem:[%s1561_s4 + $0x10] sm:$0xff] }
  0x11   :  { %154 = vperm.xlu1 %1013, %v88_v24   ;;  %v28_v47 = vld [vmem:[%s1560_s1] sm:$0xff]  ;;  %v77_v51 = vld [vmem:[%s1559_s2 + $0x8] sm:$0xff]  ;;  %v30_v53 = vld [vmem:[%s1560_s1 + $0x10] sm:$0xff] }
  0x12   :  { %951 = vmatpush.xpose.msk.msra.mxu0 %vm172_vm0, %v55_v11  ;;  %v80_v48 = vld [vmem:[%s1559_s2 + $0x20] sm:$0xff]  ;;  %v500_v54 = vld [vmem:[%s1561_s4 + $0x28] sm:$0xff]  ;;  %v498_v55 = vld [vmem:[%s1561_s4 + $0x18] sm:$0xff] }
  0x13   :  { %983 = vmatpush.xpose.msk.msra.mxu1 %vm172_vm0, %v71_v12  ;;  %144 = vperm.xlu2 %1014, %v86_v37   ;;  %v495_v52 = vld [vmem:[%s1561_s4] sm:$0xff]  ;;  %v31_v56 = vld [vmem:[%s1560_s1 + $0x18] sm:$0xff]  ;;  %v501_v58 = vld [vmem:[%s1561_s4 + $0x30] sm:$0xff] }
  0x14   :  { %139 = vperm.xlu0 %1012, %v85_v15   ;;  %v503_v57 = vld [vmem:[%s1561_s4 + $0x40] sm:$0xff]  ;;  %v506_v60 = vld [vmem:[%s1561_s4 + $0x58] sm:$0xff]  ;;  %v504_v61 = vld [vmem:[%s1561_s4 + $0x48] sm:$0xff] }
  0x15   :  { %v32_v59 = vld [vmem:[%s1560_s1 + $0x20] sm:$0xff]  ;;  %v496_v62 = vld [vmem:[%s1561_s4 + $0x8] sm:$0xff]  ;;  %v509_v0 = vld [vmem:[%s1561_s4 + $0x70] sm:$0xff] }
  0x16   :  { %952 = vmatpush.xpose.msk.msra.mxu0 %vm172_vm0, %v54_v13  ;;  %v33_v63 = vld [vmem:[%s1560_s1 + $0x28] sm:$0xff]  ;;  %v507_v1 = vld [vmem:[%s1561_s4 + $0x60] sm:$0xff]  ;;  %v34_v3 = vld [vmem:[%s1560_s1 + $0x30] sm:$0xff] }
  0x17   :  { %984 = vmatpush.xpose.msk.msra.mxu1 %vm172_vm0, %v70_v14  ;;  %v499_v2 = vld [vmem:[%s1561_s4 + $0x20] sm:$0xff]  ;;  %v754_v4 = vld [vmem:[%s1562_s5 + $0x8] sm:$0xff]  ;;  %v510_v5 = vld [vmem:[%s1561_s4 + $0x78] sm:$0xff] }
  0x18   :  { %v502_v6 = vld [vmem:[%s1561_s4 + $0x38] sm:$0xff]  ;;  %v757_v8 = vld [vmem:[%s1562_s5 + $0x20] sm:$0xff]  ;;  %v755_v9 = vld [vmem:[%s1562_s5 + $0x10] sm:$0xff] }
  0x19   :  { %134 = vperm.xlu1 %1013, %v84_v31   ;;  %v35_v7 = vld [vmem:[%s1560_s1 + $0x38] sm:$0xff]  ;;  %v505_v10 = vld [vmem:[%s1561_s4 + $0x50] sm:$0xff]  ;;  %v36_v11 = vld [vmem:[%s1560_s1 + $0x40] sm:$0xff] }
  0x1a   :  { %953 = vmatpush.xpose.msk.msra.mxu0 %vm172_vm0, %v53_v16  ;;  %v760_v12 = vld [vmem:[%s1562_s5 + $0x38] sm:$0xff]  ;;  %v758_v13 = vld [vmem:[%s1562_s5 + $0x28] sm:$0xff]  ;;  %v763_v16 = vld [vmem:[%s1562_s5 + $0x50] sm:$0xff] }
  0x1b   :  { %985 = vmatpush.xpose.msk.msra.mxu1 %vm172_vm0, %v69_v17  ;;  %129 = vperm.xlu2 %1014, %v83_v43   ;;  %v508_v14 = vld [vmem:[%s1561_s4 + $0x68] sm:$0xff]  ;;  %v761_v17 = vld [vmem:[%s1562_s5 + $0x40] sm:$0xff]  ;;  %v39_v24 = vld [vmem:[%s1560_s1 + $0x58] sm:$0xff] }
  0x1c   :  { %124 = vperm.xlu0 %1012, %v82_v21   ;;  %v37_v15 = vld [vmem:[%s1560_s1 + $0x48] sm:$0xff]  ;;  %v753_v18 = vld [vmem:[%s1562_s5] sm:$0xff]  ;;  %v764_v21 = vld [vmem:[%s1562_s5 + $0x58] sm:$0xff] }
  0x1d   :  { %v762_v30 = vld [vmem:[%s1562_s5 + $0x48] sm:$0xff]  ;;  %v42_v31 = vld [vmem:[%s1560_s1 + $0x70] sm:$0xff] }
  0x1e   :  { %954 = vmatpush.xpose.msk.msra.mxu0 %vm172_vm0, %v52_v19  ;;  %v38_v19 = vld [vmem:[%s1560_s1 + $0x50] sm:$0xff] }
  0x1f   :  { %986 = vmatpush.xpose.msk.msra.mxu1 %vm172_vm0, %v68_v20  ;;  %v766_v20 = vld [vmem:[%s1562_s5 + $0x68] sm:$0xff] }
  0x21   :  { %119 = vperm.xlu1 %1013, %v81_v38  }
  0x22   :  { %955 = vmatpush.xpose.msk.msra.mxu0 %vm172_vm0, %v51_v22  ;;  %v756_v22 = vld [vmem:[%s1562_s5 + $0x18] sm:$0xff] }
  0x23   :  { %987 = vmatpush.xpose.msk.msra.mxu1 %vm172_vm0, %v67_v23  ;;  %114 = vperm.xlu2 %1014, %v80_v48   ;;  %v12_v23 = vstv %s1563_s6 }
  0x24   :  { %109 = vperm.xlu0 %1012, %v79_v27   ;;  %13 = vst [vmem:[#allocation2] sm:$0x1] %v12_v23  ;;  %v40_v27 = vld [vmem:[%s1560_s1 + $0x60] sm:$0xff] }
  0x26   :  { %956 = vmatpush.xpose.msk.msra.mxu0 %vm172_vm0, %v50_v25 }
  0x27   :  { %988 = vmatpush.xpose.msk.msra.mxu1 %vm172_vm0, %v66_v26  ;;  %v767_v26 = vld [vmem:[%s1562_s5 + $0x70] sm:$0xff] }
  0x29   :  { %104 = vperm.xlu1 %1013, %v78_v44  }
  0x2a   :  { %957 = vmatpush.xpose.msk.msra.mxu0 %vm172_vm0, %v49_v28  ;;  %v759_v28 = vld [vmem:[%s1562_s5 + $0x30] sm:$0xff] }
  0x2b   :  { %989 = vmatpush.xpose.msk.msra.mxu1 %vm172_vm0, %v65_v29  ;;  %99 = vperm.xlu2 %1014, %v77_v51   ;;  %v923_v25 = vld [vmem:[#allocation2] sm:$0x1]  ;;  %v41_v29 = vld [vmem:[%s1560_s1 + $0x68] sm:$0xff] }
  0x2c   :  { %94 = vperm.xlu0 %1012, %v76_v34   ;;  %v768_v34 = vld [vmem:[%s1562_s5 + $0x78] sm:$0xff] }
  0x2e   :  { %958 = vmatpush.xpose.msk.msra.mxu0 %vm172_vm0, %v48_v32  ;;  %v765_v32 = vld [vmem:[%s1562_s5 + $0x60] sm:$0xff] }
  0x2f   :  { %990 = vmatpush.xpose.msk.msra.mxu1 %vm172_vm0, %v64_v33  ;;  %v43_v33 = vld [vmem:[%s1560_s1 + $0x78] sm:$0xff] }
  0x31   :  { %513 = vperm.xlu1 %1013, %v495_v52  }
  0x32   :  { %959 = vmatpush.xpose.msk.msra.mxu0 %vm172_vm0, %v47_v35 }
  0x33   :  { %991 = vmatpush.xpose.msk.msra.mxu1 %vm172_vm0, %v63_v36  ;;  %518 = vperm.xlu2 %1014, %v496_v62  }
  0x34   :  { %523 = vperm.xlu0 %1012, %v497_v50  }
  0x36   :  { %960 = vmatpush.xpose.msk.msra.mxu0 %vm172_vm0, %v46_v39 }
  0x37   :  { %992 = vmatpush.xpose.msk.msra.mxu1 %vm172_vm0, %v62_v40 }
  0x39   :  { %528 = vperm.xlu1 %1013, %v498_v55  }
  0x3a   :  { %961 = vmatpush.xpose.msk.msra.mxu0 %vm172_vm0, %v45_v41 }
  0x3b   :  { %993 = vmatpush.xpose.msk.msra.mxu1 %vm172_vm0, %v61_v42  ;;  %533 = vperm.xlu2 %1014, %v499_v2  }
  0x3c   :  { %538 = vperm.xlu0 %1012, %v500_v54  }
  0x3e   :  { %962 = vmatpush.xpose.msk.msra.mxu0 %vm172_vm0, %v44_v45 }
  0x3f   :  { %994 = vmatpush.xpose.msk.msra.mxu1 %vm172_vm0, %v60_v46 }
  0x41   :  { %963 = vmatmul.msk.f32.vlgmr.msra.gmra.mxu0 %vm172_vm0, %v28_v47  ;;  %543 = vperm.xlu1 %1013, %v501_v58  }
  0x42   :  { %995 = vmatmul.msk.f32.vlgmr.msra.gmra.mxu1 %vm172_vm0, %v28_v47 }
  0x43   :  { %548 = vperm.xlu2 %1014, %v502_v6  }
  0x44   :  { %553 = vperm.xlu0 %1012, %v503_v57  }
  0x49   :  { %964 = vmatmul.msk.f32.gmra.mxu0 %vm172_vm0, %v29_v49  ;;  %558 = vperm.xlu1 %1013, %v504_v61  }
  0x4a   :  { %996 = vmatmul.msk.f32.gmra.mxu1 %vm172_vm0, %v29_v49 }
  0x4b   :  { %563 = vperm.xlu2 %1014, %v505_v10  }
  0x4c   :  { %568 = vperm.xlu0 %1012, %v506_v60  }
  0x51   :  { %965 = vmatmul.msk.f32.gmra.mxu0 %vm172_vm0, %v30_v53  ;;  %573 = vperm.xlu1 %1013, %v507_v1  }
  0x52   :  { %997 = vmatmul.msk.f32.gmra.mxu1 %vm172_vm0, %v30_v53 }
  0x53   :  { %578 = vperm.xlu2 %1014, %v508_v14  }
  0x54   :  { %583 = vperm.xlu0 %1012, %v509_v0  }
  0x59   :  { %966 = vmatmul.msk.f32.gmra.mxu0 %vm172_vm0, %v31_v56  ;;  %588 = vperm.xlu1 %1013, %v510_v5  }
  0x5a   :  { %998 = vmatmul.msk.f32.gmra.mxu1 %vm172_vm0, %v31_v56 }
  0x5b   :  { %771 = vperm.xlu2 %1014, %v753_v18  }
  0x5c   :  { %776 = vperm.xlu0 %1012, %v754_v4  }
  0x61   :  { %967 = vmatmul.msk.f32.gmra.mxu0 %vm172_vm0, %v32_v59  ;;  %781 = vperm.xlu1 %1013, %v755_v9  }
  0x62   :  { %999 = vmatmul.msk.f32.gmra.mxu1 %vm172_vm0, %v32_v59 }
  0x63   :  { %786 = vperm.xlu2 %1014, %v756_v22  }
  0x64   :  { %791 = vperm.xlu0 %1012, %v757_v8  }
  0x69   :  { %968 = vmatmul.msk.f32.gmra.mxu0 %vm172_vm0, %v33_v63  ;;  %796 = vperm.xlu1 %1013, %v758_v13  }
  0x6a   :  { %1000 = vmatmul.msk.f32.gmra.mxu1 %vm172_vm0, %v33_v63  ;;  %v150_v63 = vpop.permute.xlu2 %149 }
  0x6b   :  { %801 = vperm.xlu2 %1014, %v759_v28  }
  0x6c   :  { %806 = vperm.xlu0 %1012, %v760_v12  }
  0x71   :  { %969 = vmatmul.msk.f32.gmra.mxu0 %vm172_vm0, %v34_v3  ;;  %811 = vperm.xlu1 %1013, %v761_v17  }
  0x72   :  { %1001 = vmatmul.msk.f32.gmra.mxu1 %vm172_vm0, %v34_v3  ;;  %v145_v6 = vpop.permute.xlu2 %144 }
  0x73   :  { %816 = vperm.xlu2 %1014, %v762_v30  }
  0x74   :  { %821 = vperm.xlu0 %1012, %v763_v16  }
  0x76   :  { %v170_v59 = vpop.permute.xlu0 %169 }
  0x79   :  { %970 = vmatmul.msk.f32.gmra.mxu0 %vm172_vm0, %v35_v7  ;;  %826 = vperm.xlu1 %1013, %v764_v21  }
  0x7a   :  { %1002 = vmatmul.msk.f32.gmra.mxu1 %vm172_vm0, %v35_v7 }
  0x7b   :  { %831 = vperm.xlu2 %1014, %v765_v32   ;;  %v160_v62 = vpop.permute.xlu1 %159 }
  0x7c   :  { %836 = vperm.xlu0 %1012, %v766_v20  }
  0x7e   :  { %v165_v2 = vpop.permute.xlu0 %164 }
  0x81   :  { %971 = vmatmul.msk.f32.gmra.mxu0 %vm172_vm0, %v36_v11  ;;  %841 = vperm.xlu1 %1013, %v767_v26  }
  0x82   :  { %1003 = vmatmul.msk.f32.gmra.mxu1 %vm172_vm0, %v36_v11 }
  0x83   :  { %846 = vperm.xlu2 %1014, %v768_v34   ;;  %v155_v3 = vpop.permute.xlu1 %154 }
  0x84   :  { %926 = vperm.xlu0 %1012, %v923_v25  }
  0x86   :  { %v140_v7 = vpop.permute.xlu0 %139 }
  0x89   :  { %972 = vmatmul.msk.f32.gmra.mxu0 %vm172_vm0, %v37_v15 }
  0x8a   :  { %1004 = vmatmul.msk.f32.gmra.mxu1 %vm172_vm0, %v37_v15 }
  0x8b   :  { %v135_v14 = vpop.permute.xlu1 %134 }
  0x91   :  { %973 = vmatmul.msk.f32.gmra.mxu0 %vm172_vm0, %v38_v19 }
  0x92   :  { %1005 = vmatmul.msk.f32.gmra.mxu1 %vm172_vm0, %v38_v19  ;;  %v130_v19 = vpop.permute.xlu2 %129 }
  0x99   :  { %974 = vmatmul.msk.f32.gmra.mxu0 %vm172_vm0, %v39_v24 }
  0x9a   :  { %1006 = vmatmul.msk.f32.gmra.mxu1 %vm172_vm0, %v39_v24  ;;  %v125_v24 = vpop.permute.xlu0 %124 }
  0xa1   :  { %975 = vmatmul.msk.f32.gmra.mxu0 %vm172_vm0, %v40_v27 }
  0xa2   :  { %1007 = vmatmul.msk.f32.gmra.mxu1 %vm172_vm0, %v40_v27 }
  0xa9   :  { %976 = vmatmul.msk.f32.gmra.mxu0 %vm172_vm0, %v41_v29 }
  0xaa   :  { %1008 = vmatmul.msk.f32.gmra.mxu1 %vm172_vm0, %v41_v29 }
  0xb1   :  { %977 = vmatmul.msk.f32.gmra.mxu0 %vm172_vm0, %v42_v31 }
  0xb2   :  { %1009 = vmatmul.msk.f32.gmra.mxu1 %vm172_vm0, %v42_v31 }
  0xb9   :  { %978 = vmatmul.msk.f32.gmra.mxu0 %vm172_vm0, %v43_v33 }
  0xba   :  { %1010 = vmatmul.msk.f32.gmra.mxu1 %vm172_vm0, %v43_v33 }
  0xbe   :  { %v1411_v35 = vpop.f32.mrf.mxu0 }
  0xbf   :  { %v1413_v36 = vpop.f32.mrf.mxu1 }
  0xc6   :  { %v1415_v37 = vpop.f32.mrf.mxu0 }
  0xc7   :  { %v1417_v38 = vpop.f32.mrf.mxu1 }
  0xce   :  { %v1419_v39 = vpop.f32.mrf.mxu0 }
  0xcf   :  { %v1421_v40 = vpop.f32.mrf.mxu1 }
  0xd6   :  { %v1423_v41 = vpop.f32.mrf.mxu0 }
  0xd7   :  { %v1425_v42 = vpop.f32.mrf.mxu1 }
  0xde   :  { %v1427_v43 = vpop.f32.mrf.mxu0 }
  0xdf   :  { %v1429_v44 = vpop.f32.mrf.mxu1 }
  0xe6   :  { %v1431_v45 = vpop.f32.mrf.mxu0 }
  0xe7   :  { %v1433_v46 = vpop.f32.mrf.mxu1 }
  0xee   :  { %v1435_v47 = vpop.f32.mrf.mxu0 }
  0xef   :  { %v1437_v48 = vpop.f32.mrf.mxu1 }
  0xf6   :  { %v1439_v49 = vpop.f32.mrf.mxu0 }
  0xf7   :  { %v1441_v50 = vpop.f32.mrf.mxu1 }
  0xfe   :  { %v358_v51 = vpop.f32.mrf.mxu0 }
  0xff   :  { %v423_v52 = vpop.f32.mrf.mxu1 }
 0x106   :  { %v361_v53 = vpop.f32.mrf.mxu0 }
 0x107   :  { %v426_v54 = vpop.f32.mrf.mxu1  ;;  %v362_v33 = vadd.f32 %v361_v53, %v140_v7  ;;  %v110_v53 = vpop.permute.xlu0 %109 }
 0x108   :  { %v427_v34 = vadd.f32 %v426_v54, %v140_v7  ;;  %v353_v54 = vadd.f32 %v1435_v47, %v125_v24 }
 0x10e   :  { %v364_v55 = vpop.f32.mrf.mxu0 }
 0x10f   :  { %v429_v56 = vpop.f32.mrf.mxu1  ;;  %v365_v29 = vadd.f32 %v364_v55, %v145_v6  ;;  %v356_v55 = vadd.f32 %v1439_v49, %v130_v19 }
 0x110   :  { %v430_v30 = vadd.f32 %v429_v56, %v145_v6  ;;  %v421_v56 = vadd.f32 %v1441_v50, %v130_v19 }
 0x111   :  { %v461_v49 = vmax.f32 %v356_v55, 0.0  ;;  %v494_v55 = vld [vmem:[%s1564_s3 + $0x78] sm:$0xff] }
 0x112   :  { %v462_v6 = vmax.f32 %v421_v56, 0.0 }
 0x116   :  { %v367_v57 = vpop.f32.mrf.mxu0 }
 0x117   :  { %v432_v58 = vpop.f32.mrf.mxu1  ;;  %v368_v25 = vadd.f32 %v367_v57, %v150_v63  ;;  %v424_v57 = vadd.f32 %v423_v52, %v135_v14 }
 0x118   :  { %v433_v26 = vadd.f32 %v432_v58, %v150_v63  ;;  %v467_v58 = vmax.f32 %v365_v29, 0.0  ;;  %v468_v63 = vmax.f32 %v430_v30, 0.0  ;;  %v489_v29 = vld [vmem:[%s1564_s3 + $0x50] sm:$0xff]  ;;  %v490_v30 = vld [vmem:[%s1564_s3 + $0x58] sm:$0xff] }
 0x119   :  { %v464_v52 = vmax.f32 %v424_v57, 0.0  ;;  %v493_v57 = vld [vmem:[%s1564_s3 + $0x70] sm:$0xff] }
 0x11e   :  { %v370_v60 = vpop.f32.mrf.mxu0 }
 0x11f   :  { %v435_v61 = vpop.f32.mrf.mxu1  ;;  %v371_v20 = vadd.f32 %v370_v60, %v155_v3  ;;  %v470_v60 = vmax.f32 %v433_v26, 0.0  ;;  %v486_v26 = vld [vmem:[%s1564_s3 + $0x38] sm:$0xff] }
 0x120   :  { %v436_v21 = vadd.f32 %v435_v61, %v155_v3  ;;  %v120_v61 = vpop.permute.xlu1 %119  ;;  %v418_v3 = vadd.f32 %v1437_v48, %v125_v24  ;;  %v484_v24 = vld [vmem:[%s1564_s3 + $0x28] sm:$0xff] }
 0x121   :  { %v471_v31 = vmax.f32 %v371_v20, 0.0 }
 0x122   :  { %v472_v32 = vmax.f32 %v436_v21, 0.0  ;;  %v460_v47 = vmax.f32 %v418_v3, 0.0 }
 0x126   :  { %v373_v0 = vpop.f32.mrf.mxu0 }
 0x127   :  { %v438_v1 = vpop.f32.mrf.mxu1  ;;  %v374_v15 = vadd.f32 %v373_v0, %v160_v62  ;;  %v115_v0 = vpop.permute.xlu2 %114 }
 0x128   :  { %v439_v16 = vadd.f32 %v438_v1, %v160_v62  ;;  %v359_v62 = vadd.f32 %v358_v51, %v135_v14  ;;  %v465_v1 = vmax.f32 %v362_v33, 0.0  ;;  %v347_v50 = vadd.f32 %v1427_v43, %v115_v0  ;;  %v105_v48 = vpop.permute.xlu1 %104  ;;  %v95_v14 = vpop.permute.xlu0 %94 }
 0x129   :  { %v473_v27 = vmax.f32 %v374_v15, 0.0  ;;  %v412_v7 = vadd.f32 %v1429_v44, %v115_v0  ;;  %v406_v43 = vadd.f32 %v1421_v40, %v105_v48 }
 0x12a   :  { %v474_v28 = vmax.f32 %v439_v16, 0.0  ;;  %v463_v51 = vmax.f32 %v359_v62, 0.0 }
 0x12b   :  { %v456_v44 = vmax.f32 %v412_v7, 0.0  ;;  %v452_v19 = vmax.f32 %v406_v43, 0.0 }
 0x12e   :  { %v376_v4 = vpop.f32.mrf.mxu0 }
 0x12f   :  { %v441_v5 = vpop.f32.mrf.mxu1  ;;  %v377_v10 = vadd.f32 %v376_v4, %v165_v2  ;;  %v350_v4 = vadd.f32 %v1431_v45, %v120_v61 }
 0x130   :  { %v442_v11 = vadd.f32 %v441_v5, %v165_v2  ;;  %v466_v2 = vmax.f32 %v427_v34, 0.0  ;;  %v415_v5 = vadd.f32 %v1433_v46, %v120_v61  ;;  %v100_v46 = vpop.permute.xlu2 %99  ;;  %v491_v34 = vld [vmem:[%s1564_s3 + $0x60] sm:$0xff] }
 0x131   :  { %v475_v22 = vmax.f32 %v377_v10, 0.0  ;;  %v409_v10 = vadd.f32 %v1425_v42, %v110_v53  ;;  %v457_v45 = vmax.f32 %v350_v4, 0.0  ;;  %v338_v15 = vadd.f32 %v1415_v37, %v100_v46 }
 0x132   :  { %v476_v23 = vmax.f32 %v442_v11, 0.0  ;;  %v458_v11 = vmax.f32 %v415_v5, 0.0 }
 0x133   :  { %v454_v42 = vmax.f32 %v409_v10, 0.0  ;;  %v449_v40 = vmax.f32 %v338_v15, 0.0 }
 0x136   :  { %v379_v8 = vpop.f32.mrf.mxu0 }
 0x137   :  { %v444_v9 = vpop.f32.mrf.mxu1  ;;  %v380_v12 = vadd.f32 %v379_v8, %v170_v59  ;;  %v459_v8 = vmax.f32 %v353_v54, 0.0 }
 0x138   :  { %v445_v13 = vadd.f32 %v444_v9, %v170_v59  ;;  %v469_v59 = vmax.f32 %v368_v25, 0.0  ;;  %v344_v9 = vadd.f32 %v1423_v41, %v110_v53  ;;  %v403_v41 = vadd.f32 %v1417_v38, %v100_v46  ;;  %v479_v38 = vld [vmem:[%s1564_s3] sm:$0xff]  ;;  %v485_v25 = vld [vmem:[%s1564_s3 + $0x30] sm:$0xff]  ;;  %v519_v33 = vpop.permute.xlu2 %518 }
 0x139   :  { %v477_v17 = vmax.f32 %v380_v12, 0.0  ;;  %v341_v12 = vadd.f32 %v1419_v39, %v105_v48 }
 0x13a   :  { %v478_v18 = vmax.f32 %v445_v13, 0.0  ;;  %v455_v13 = vmax.f32 %v347_v50, 0.0  ;;  %v453_v16 = vmax.f32 %v344_v9, 0.0  ;;  %v450_v20 = vmax.f32 %v403_v41, 0.0 }
 0x13b   :  { %591 = vmatpush.msra.mxu2 %v477_v17  ;;  %v335_v17 = vadd.f32 %v1411_v35, %v95_v14  ;;  %v451_v39 = vmax.f32 %v341_v12, 0.0  ;;  %v480_v35 = vld [vmem:[%s1564_s3 + $0x8] sm:$0xff] }
 0x13c   :  { %656 = vmatpush.msra.mxu3 %v478_v18  ;;  %v400_v18 = vadd.f32 %v1413_v36, %v95_v14  ;;  %v481_v36 = vld [vmem:[%s1564_s3 + $0x10] sm:$0xff] }
 0x13d   :  { %592 = vmatpush.msra.mxu2 %v475_v22  ;;  %v447_v21 = vmax.f32 %v335_v17, 0.0  ;;  %v482_v22 = vld [vmem:[%s1564_s3 + $0x18] sm:$0xff] }
 0x13e   :  { %657 = vmatpush.msra.mxu3 %v476_v23  ;;  %v448_v37 = vmax.f32 %v400_v18, 0.0  ;;  %v483_v23 = vld [vmem:[%s1564_s3 + $0x20] sm:$0xff] }
 0x13f   :  { %593 = vmatpush.msra.mxu2 %v473_v27  ;;  %v487_v27 = vld [vmem:[%s1564_s3 + $0x40] sm:$0xff] }
 0x140   :  { %658 = vmatpush.msra.mxu3 %v474_v28  ;;  %v488_v28 = vld [vmem:[%s1564_s3 + $0x48] sm:$0xff]  ;;  %v1503_v62 = vpop.permute.xlu2 %533 }
 0x141   :  { %594 = vmatpush.msra.mxu2 %v471_v31  ;;  %v514_v31 = vpop.permute.xlu1 %513 }
 0x142   :  { %659 = vmatpush.msra.mxu3 %v472_v32  ;;  %v524_v32 = vpop.permute.xlu0 %523 }
 0x143   :  { %595 = vmatpush.msra.mxu2 %v469_v59 }
 0x144   :  { %660 = vmatpush.msra.mxu3 %v470_v60  ;;  %v492_v60 = vld [vmem:[%s1564_s3 + $0x68] sm:$0xff] }
 0x145   :  { %596 = vmatpush.msra.mxu2 %v467_v58 }
 0x146   :  { %661 = vmatpush.msra.mxu3 %v468_v63 }
 0x147   :  { %597 = vmatpush.msra.mxu2 %v465_v1 }
 0x148   :  { %662 = vmatpush.msra.mxu3 %v466_v2  ;;  %v1512_v0 = vpop.permute.xlu2 %548 }
 0x149   :  { %598 = vmatpush.msra.mxu2 %v463_v51  ;;  %v529_v59 = vpop.permute.xlu1 %528 }
 0x14a   :  { %663 = vmatpush.msra.mxu3 %v464_v52  ;;  %v1501_v61 = vpop.permute.xlu0 %538 }
 0x14b   :  { %599 = vmatpush.msra.mxu2 %v461_v49 }
 0x14c   :  { %664 = vmatpush.msra.mxu3 %v462_v6 }
 0x14d   :  { %600 = vmatpush.msra.mxu2 %v459_v8 }
 0x14e   :  { %665 = vmatpush.msra.mxu3 %v460_v47 }
 0x14f   :  { %601 = vmatpush.msra.mxu2 %v457_v45 }
 0x150   :  { %666 = vmatpush.msra.mxu3 %v458_v11  ;;  %v1521_v2 = vpop.permute.xlu2 %563 }
 0x151   :  { %602 = vmatpush.msra.mxu2 %v455_v13  ;;  %v1508_v58 = vpop.permute.xlu1 %543 }
 0x152   :  { %667 = vmatpush.msra.mxu3 %v456_v44  ;;  %v1510_v63 = vpop.permute.xlu0 %553 }
 0x153   :  { %603 = vmatpush.msra.mxu2 %v453_v16 }
 0x154   :  { %668 = vmatpush.msra.mxu3 %v454_v42 }
 0x155   :  { %604 = vmatpush.msra.mxu2 %v451_v39 }
 0x156   :  { %669 = vmatpush.msra.mxu3 %v452_v19 }
 0x157   :  { %605 = vmatpush.msra.mxu2 %v449_v40 }
 0x158   :  { %670 = vmatpush.msra.mxu3 %v450_v20  ;;  %v1527_v52 = vpop.permute.xlu2 %578 }
 0x159   :  { %606 = vmatpush.msra.mxu2 %v447_v21  ;;  %v1517_v56 = vpop.permute.xlu1 %558 }
 0x15a   :  { %671 = vmatpush.msra.mxu3 %v448_v37  ;;  %607 = vmatmul.f32.vlgmr.msra.gmra.mxu2 %v479_v38  ;;  %v1519_v1 = vpop.permute.xlu0 %568 }
 0x15b   :  { %672 = vmatmul.f32.vlgmr.msra.gmra.mxu3 %v479_v38 }
 0x160   :  { %v772_v11 = vpop.permute.xlu2 %771 }
 0x161   :  { %v1523_v53 = vpop.permute.xlu1 %573 }
 0x162   :  { %610 = vmatmul.f32.gmra.mxu2 %v480_v35  ;;  %v1525_v51 = vpop.permute.xlu0 %583 }
 0x163   :  { %675 = vmatmul.f32.gmra.mxu3 %v480_v35 }
 0x169   :  { %v1529_v48 = vpop.permute.xlu1 %588 }
 0x16a   :  { %613 = vmatmul.f32.gmra.mxu2 %v481_v36  ;;  %v777_v45 = vpop.permute.xlu0 %776 }
 0x16b   :  { %678 = vmatmul.f32.gmra.mxu3 %v481_v36 }
 0x171   :  { %v782_v39 = vpop.permute.xlu1 %781 }
 0x172   :  { %616 = vmatmul.f32.gmra.mxu2 %v482_v22 }
 0x173   :  { %681 = vmatmul.f32.gmra.mxu3 %v482_v22 }
 0x17a   :  { %619 = vmatmul.f32.gmra.mxu2 %v483_v23 }
 0x17b   :  { %684 = vmatmul.f32.gmra.mxu3 %v483_v23 }
 0x182   :  { %622 = vmatmul.f32.gmra.mxu2 %v484_v24 }
 0x183   :  { %687 = vmatmul.f32.gmra.mxu3 %v484_v24  ;;  %v787_v24 = vpop.permute.xlu2 %786 }
 0x18a   :  { %625 = vmatmul.f32.gmra.mxu2 %v485_v25 }
 0x18b   :  { %690 = vmatmul.f32.gmra.mxu3 %v485_v25 }
 0x192   :  { %628 = vmatmul.f32.gmra.mxu2 %v486_v26 }
 0x193   :  { %693 = vmatmul.f32.gmra.mxu3 %v486_v26 }
 0x19a   :  { %631 = vmatmul.f32.gmra.mxu2 %v487_v27 }
 0x19b   :  { %696 = vmatmul.f32.gmra.mxu3 %v487_v27 }
 0x1a2   :  { %634 = vmatmul.f32.gmra.mxu2 %v488_v28 }
 0x1a3   :  { %699 = vmatmul.f32.gmra.mxu3 %v488_v28 }
 0x1aa   :  { %637 = vmatmul.f32.gmra.mxu2 %v489_v29 }
 0x1ab   :  { %702 = vmatmul.f32.gmra.mxu3 %v489_v29 }
 0x1b2   :  { %640 = vmatmul.f32.gmra.mxu2 %v490_v30 }
 0x1b3   :  { %705 = vmatmul.f32.gmra.mxu3 %v490_v30 }
 0x1ba   :  { %643 = vmatmul.f32.gmra.mxu2 %v491_v34 }
 0x1bb   :  { %708 = vmatmul.f32.gmra.mxu3 %v491_v34 }
 0x1c2   :  { %646 = vmatmul.f32.gmra.mxu2 %v492_v60 }
 0x1c3   :  { %711 = vmatmul.f32.gmra.mxu3 %v492_v60  ;;  %v792_v60 = vpop.permute.xlu0 %791 }
 0x1ca   :  { %649 = vmatmul.f32.gmra.mxu2 %v493_v57 }
 0x1cb   :  { %714 = vmatmul.f32.gmra.mxu3 %v493_v57 }
 0x1d2   :  { %652 = vmatmul.f32.gmra.mxu2 %v494_v55 }
 0x1d3   :  { %717 = vmatmul.f32.gmra.mxu3 %v494_v55 }
 0x1dd   :  { %v608_v54 = vpop.f32.mrf.mxu2 }
 0x1de   :  { %v673_v3 = vpop.f32.mrf.mxu3  ;;  %v609_v4 = vadd.f32 %v608_v54, %v514_v31 }
 0x1df   :  { %v674_v5 = vadd.f32 %v673_v3, %v514_v31 }
 0x1e0   :  { %v721_v50 = vmax.f32 %v609_v4, 0.0 }
 0x1e1   :  { %v722_v7 = vmax.f32 %v674_v5, 0.0 }
 0x1e2   :  { %v849_v46 = vmul.f32 %v772_v11, %v721_v50 }
 0x1e3   :  { %v850_v12 = vmul.f32 %v772_v11, %v722_v7 }
 0x1e5   :  { %v611_v49 = vpop.f32.mrf.mxu2 }
 0x1e6   :  { %v676_v6 = vpop.f32.mrf.mxu3  ;;  %v612_v8 = vadd.f32 %v611_v49, %v519_v33 }
 0x1e7   :  { %v677_v47 = vadd.f32 %v676_v6, %v519_v33 }
 0x1e8   :  { %v723_v9 = vmax.f32 %v612_v8, 0.0 }
 0x1e9   :  { %v724_v10 = vmax.f32 %v677_v47, 0.0 }
 0x1ea   :  { %v851_v43 = vmul.f32 %v777_v45, %v723_v9 }
 0x1eb   :  { %v852_v13 = vmul.f32 %v777_v45, %v724_v10 }
 0x1ec   :  { %v881_v44 = vadd.f32 %v851_v43, %v849_v46  ;;  %v797_v46 = vpop.permute.xlu1 %796 }
 0x1ed   :  { %v902_v14 = vadd.f32 %v852_v13, %v850_v12  ;;  %v614_v15 = vpop.f32.mrf.mxu2  ;;  %v802_v12 = vpop.permute.xlu2 %801 }
 0x1ee   :  { %v679_v41 = vpop.f32.mrf.mxu3  ;;  %v615_v16 = vadd.f32 %v614_v15, %v524_v32 }
 0x1ef   :  { %v680_v42 = vadd.f32 %v679_v41, %v524_v32 }
 0x1f0   :  { %v725_v17 = vmax.f32 %v615_v16, 0.0 }
 0x1f1   :  { %v726_v18 = vmax.f32 %v680_v42, 0.0 }
 0x1f2   :  { %v853_v19 = vmul.f32 %v782_v39, %v725_v17 }
 0x1f3   :  { %v854_v40 = vmul.f32 %v782_v39, %v726_v18  ;;  %v807_v39 = vpop.permute.xlu0 %806 }
 0x1f4   :  { %v882_v20 = vadd.f32 %v881_v44, %v853_v19  ;;  %v812_v19 = vpop.permute.xlu1 %811 }
 0x1f5   :  { %v903_v21 = vadd.f32 %v902_v14, %v854_v40  ;;  %v617_v37 = vpop.f32.mrf.mxu2 }
 0x1f6   :  { %v682_v38 = vpop.f32.mrf.mxu3  ;;  %v618_v35 = vadd.f32 %v617_v37, %v529_v59 }
 0x1f7   :  { %v683_v36 = vadd.f32 %v682_v38, %v529_v59 }
 0x1f8   :  { %v727_v22 = vmax.f32 %v618_v35, 0.0 }
 0x1f9   :  { %v728_v23 = vmax.f32 %v683_v36, 0.0 }
 0x1fa   :  { %v855_v25 = vmul.f32 %v787_v24, %v727_v22 }
 0x1fb   :  { %v856_v26 = vmul.f32 %v787_v24, %v728_v23  ;;  %v817_v23 = vpop.permute.xlu2 %816 }
 0x1fc   :  { %v883_v27 = vadd.f32 %v882_v20, %v855_v25 }
 0x1fd   :  { %v904_v28 = vadd.f32 %v903_v21, %v856_v26  ;;  %v620_v29 = vpop.f32.mrf.mxu2 }
 0x1fe   :  { %v685_v30 = vpop.f32.mrf.mxu3  ;;  %v621_v31 = vadd.f32 %v620_v29, %v1503_v62 }
 0x1ff   :  { %v686_v32 = vadd.f32 %v685_v30, %v1503_v62 }
 0x200   :  { %v729_v33 = vmax.f32 %v621_v31, 0.0 }
 0x201   :  { %v730_v34 = vmax.f32 %v686_v32, 0.0 }
 0x202   :  { %v857_v57 = vmul.f32 %v792_v60, %v729_v33 }
 0x203   :  { %v858_v55 = vmul.f32 %v792_v60, %v730_v34 }
 0x204   :  { %v884_v54 = vadd.f32 %v883_v27, %v857_v57 }
 0x205   :  { %v905_v59 = vadd.f32 %v904_v28, %v858_v55  ;;  %v623_v3 = vpop.f32.mrf.mxu2 }
 0x206   :  { %v688_v4 = vpop.f32.mrf.mxu3  ;;  %v624_v43 = vadd.f32 %v623_v3, %v1501_v61 }
 0x207   :  { %v689_v13 = vadd.f32 %v688_v4, %v1501_v61 }
 0x208   :  { %v731_v16 = vmax.f32 %v624_v43, 0.0 }
 0x209   :  { %v732_v42 = vmax.f32 %v689_v13, 0.0 }
 0x20a   :  { %v859_v37 = vmul.f32 %v797_v46, %v731_v16  ;;  %v832_v16 = vpop.permute.xlu2 %831 }
 0x20b   :  { %v860_v38 = vmul.f32 %v797_v46, %v732_v42 }
 0x20d   :  { %v626_v5 = vpop.f32.mrf.mxu2  ;;  %v906_v31 = vadd.f32 %v905_v59, %v860_v38  ;;  %v827_v59 = vpop.permute.xlu1 %826 }
 0x20e   :  { %v691_v49 = vpop.f32.mrf.mxu3  ;;  %v627_v44 = vadd.f32 %v626_v5, %v1508_v58 }
 0x20f   :  { %v692_v14 = vadd.f32 %v691_v49, %v1508_v58  ;;  %v822_v49 = vpop.permute.xlu0 %821 }
 0x210   :  { %v733_v40 = vmax.f32 %v627_v44, 0.0 }
 0x211   :  { %v734_v20 = vmax.f32 %v692_v14, 0.0 }
 0x212   :  { %v861_v24 = vmul.f32 %v802_v12, %v733_v40 }
 0x213   :  { %v862_v25 = vmul.f32 %v802_v12, %v734_v20 }
 0x215   :  { %v629_v6 = vpop.f32.mrf.mxu2  ;;  %v907_v3 = vadd.f32 %v906_v31, %v862_v25 }
 0x216   :  { %v694_v50 = vpop.f32.mrf.mxu3  ;;  %v630_v17 = vadd.f32 %v629_v6, %v1512_v0 }
 0x217   :  { %v695_v18 = vadd.f32 %v694_v50, %v1512_v0 }
 0x218   :  { %v735_v35 = vmax.f32 %v630_v17, 0.0 }
 0x219   :  { %v736_v58 = vmax.f32 %v695_v18, 0.0 }
 0x21a   :  { %v863_v32 = vmul.f32 %v807_v39, %v735_v35  ;;  %v837_v35 = vpop.permute.xlu0 %836 }
 0x21b   :  { %v864_v33 = vmul.f32 %v807_v39, %v736_v58 }
 0x21d   :  { %v632_v7 = vpop.f32.mrf.mxu2 }
 0x21e   :  { %v697_v8 = vpop.f32.mrf.mxu3  ;;  %v633_v21 = vadd.f32 %v632_v7, %v1510_v63 }
 0x21f   :  { %v698_v61 = vadd.f32 %v697_v8, %v1510_v63  ;;  %v885_v63 = vadd.f32 %v884_v54, %v859_v37  ;;  %v908_v8 = vadd.f32 %v907_v3, %v864_v33 }
 0x220   :  { %v737_v0 = vmax.f32 %v633_v21, 0.0 }
 0x221   :  { %v738_v26 = vmax.f32 %v698_v61, 0.0  ;;  %v886_v55 = vadd.f32 %v885_v63, %v861_v24 }
 0x222   :  { %v865_v4 = vmul.f32 %v812_v19, %v737_v0 }
 0x223   :  { %v866_v5 = vmul.f32 %v812_v19, %v738_v26  ;;  %v887_v7 = vadd.f32 %v886_v55, %v863_v32 }
 0x225   :  { %v635_v47 = vpop.f32.mrf.mxu2 }
 0x226   :  { %v700_v9 = vpop.f32.mrf.mxu3  ;;  %v636_v36 = vadd.f32 %v635_v47, %v1517_v56 }
 0x227   :  { %v701_v22 = vadd.f32 %v700_v9, %v1517_v56 }
 0x228   :  { %v739_v34 = vmax.f32 %v636_v36, 0.0 }
 0x229   :  { %v740_v60 = vmax.f32 %v701_v22, 0.0  ;;  %v842_v22 = vpop.permute.xlu1 %841 }
 0x22a   :  { %v867_v47 = vmul.f32 %v817_v23, %v739_v34  ;;  %v847_v34 = vpop.permute.xlu2 %846 }
 0x22b   :  { %v868_v9 = vmul.f32 %v817_v23, %v740_v60 }
 0x22d   :  { %v638_v10 = vpop.f32.mrf.mxu2 }
 0x22e   :  { %v703_v45 = vpop.f32.mrf.mxu3  ;;  %v639_v27 = vadd.f32 %v638_v10, %v1521_v2 }
 0x22f   :  { %v704_v28 = vadd.f32 %v703_v45, %v1521_v2 }
 0x230   :  { %v741_v6 = vmax.f32 %v639_v27, 0.0 }
 0x231   :  { %v742_v50 = vmax.f32 %v704_v28, 0.0 }
 0x232   :  { %v869_v12 = vmul.f32 %v822_v49, %v741_v6 }
 0x233   :  { %v870_v43 = vmul.f32 %v822_v49, %v742_v50 }
 0x235   :  { %v641_v62 = vpop.f32.mrf.mxu2 }
 0x236   :  { %v706_v11 = vpop.f32.mrf.mxu3  ;;  %v642_v57 = vadd.f32 %v641_v62, %v1519_v1  ;;  %v888_v62 = vadd.f32 %v887_v7, %v865_v4 }
 0x237   :  { %v707_v56 = vadd.f32 %v706_v11, %v1519_v1  ;;  %v909_v1 = vadd.f32 %v908_v8, %v866_v5 }
 0x238   :  { %v743_v10 = vmax.f32 %v642_v57, 0.0  ;;  %v889_v42 = vadd.f32 %v888_v62, %v867_v47  ;;  %v938_v62 = vlaneseq }
 0x239   :  { %v744_v45 = vmax.f32 %v707_v56, 0.0  ;;  %v910_v17 = vadd.f32 %v909_v1, %v868_v9 }
 0x23a   :  { %v871_v18 = vmul.f32 %v827_v59, %v743_v10  ;;  %v890_v20 = vadd.f32 %v889_v42, %v869_v12  ;;  %vm940_vm2 = vcmp.lt.s32.totalorder %v938_v62, 256 }
 0x23b   :  { %v872_v39 = vmul.f32 %v827_v59, %v744_v45  ;;  %v911_v21 = vadd.f32 %v910_v17, %v870_v43 }
 0x23c   :  { %v891_v58 = vadd.f32 %v890_v20, %v871_v18 }
 0x23d   :  { %v644_v15 = vpop.f32.mrf.mxu2  ;;  %v912_v36 = vadd.f32 %v911_v21, %v872_v39 }
 0x23e   :  { %v709_v41 = vpop.f32.mrf.mxu3  ;;  %v645_v2 = vadd.f32 %v644_v15, %v1523_v53 }
 0x23f   :  { %v710_v54 = vadd.f32 %v709_v41, %v1523_v53 }
 0x240   :  { %v745_v13 = vmax.f32 %v645_v2, 0.0 }
 0x241   :  { %v746_v44 = vmax.f32 %v710_v54, 0.0 }
 0x243   :  { %v874_v61 = vmul.f32 %v832_v16, %v746_v44 }
 0x245   :  { %v647_v29 = vpop.f32.mrf.mxu2  ;;  %v913_v25 = vadd.f32 %v912_v36, %v874_v61 }
 0x246   :  { %v712_v30 = vpop.f32.mrf.mxu3  ;;  %v648_v11 = vadd.f32 %v647_v29, %v1527_v52 }
 0x247   :  { %v713_v46 = vadd.f32 %v712_v30, %v1527_v52  ;;  %v873_v52 = vmul.f32 %v832_v16, %v745_v13 }
 0x248   :  { %v747_v19 = vmax.f32 %v648_v11, 0.0 }
 0x249   :  { %v748_v40 = vmax.f32 %v713_v46, 0.0 }
 0x24a   :  { %v875_v23 = vmul.f32 %v837_v35, %v747_v19 }
 0x24b   :  { %v876_v24 = vmul.f32 %v837_v35, %v748_v40 }
 0x24d   :  { %v650_v14 = vpop.f32.mrf.mxu2  ;;  %v914_v31 = vadd.f32 %v913_v25, %v876_v24 }
 0x24e   :  { %v715_v15 = vpop.f32.mrf.mxu3  ;;  %v651_v53 = vadd.f32 %v650_v14, %v1525_v51 }
 0x24f   :  { %v716_v41 = vadd.f32 %v715_v15, %v1525_v51  ;;  %v892_v51 = vadd.f32 %v891_v58, %v873_v52 }
 0x250   :  { %v749_v37 = vmax.f32 %v651_v53, 0.0 }
 0x251   :  { %v750_v38 = vmax.f32 %v716_v41, 0.0  ;;  %v893_v63 = vadd.f32 %v892_v51, %v875_v23 }
 0x252   :  { %v877_v27 = vmul.f32 %v842_v22, %v749_v37 }
 0x253   :  { %v878_v28 = vmul.f32 %v842_v22, %v750_v38 }
 0x254   :  { %v894_v60 = vadd.f32 %v893_v63, %v877_v27 }
 0x255   :  { %v653_v0 = vpop.f32.mrf.mxu2  ;;  %v915_v57 = vadd.f32 %v914_v31, %v878_v28 }
 0x256   :  { %v718_v26 = vpop.f32.mrf.mxu3  ;;  %v654_v29 = vadd.f32 %v653_v0, %v1529_v48 }
 0x257   :  { %v719_v30 = vadd.f32 %v718_v26, %v1529_v48  ;;  %v927_v48 = vpop.permute.xlu0 %926 }
 0x258   :  { %v751_v32 = vmax.f32 %v654_v29, 0.0  ;;  %v929_v9 = vperm.slane %v927_v48, 0 }
 0x259   :  { %v752_v33 = vmax.f32 %v719_v30, 0.0 }
 0x25a   :  { %v879_v56 = vmul.f32 %v847_v34, %v751_v32 }
 0x25b   :  { %v880_v55 = vmul.f32 %v847_v34, %v752_v33 }
 0x25c   :  { %v895_v3 = vadd.f32 %v894_v60, %v879_v56 }
 0x25d   :  { %v916_v4 = vadd.f32 %v915_v57, %v880_v55 }
 0x25e   :  { %v896_v5 = vrot.slane %v895_v3, 4 }
 0x25f   :  { %v917_v49 = vrot.slane %v916_v4, 4 }
 0x260   :  { %v897_v6 = vadd.f32 %v896_v5, %v895_v3 }
 0x261   :  { %v918_v50 = vadd.f32 %v917_v49, %v916_v4 }
 0x262   :  { %v898_v2 = vrot.slane %v897_v6, 2 }
 0x263   :  { %v919_v54 = vrot.slane %v918_v50, 2 }
 0x264   :  { %v899_v59 = vadd.f32 %v898_v2, %v897_v6 }
 0x265   :  { %v920_v7 = vadd.f32 %v919_v54, %v918_v50 }
 0x266   :  { %v900_v8 = vrot.slane %v899_v59, 1 }
 0x267   :  { %v921_v47 = vrot.slane %v920_v7, 1 }
 0x268   :  { %v901_v10 = vadd.f32 %v900_v8, %v899_v59 }
 0x269   :  { %v922_v45 = vadd.f32 %v921_v47, %v920_v7 }
 0x26a   :  { %v930_v11 = vadd.f32 %v929_v9, %v901_v10 }
 0x26b   :  { %v931_v1 = vadd.f32 %v929_v9, %v922_v45 }
 0x26d   :  { %v934_v46 = vrot.slane %v931_v1, 7 }
 0x26f   :  { %v936_v12 = vsel %vm935_vm1, %v930_v11, %v934_v46 }
 0x270   :  { %942 = vst.msk [vmem:[%s1565_s7] sm:$0x3] %vm940_vm2, %v936_v12 }

</bundles_post_ra>
